<compile_context>
chip_gen: v7x
topology: tpu7x:2x2x1
jax: 0.10.0
libtpu: 0.0.40
codegen_flags: <defaults>
</compile_context>

<pallas_src>
import functools

import jax
import jax.numpy as jnp
from jax.experimental import pallas as pl
from jax.experimental.pallas import tpu as pltpu


def _round_up(x, m):
    return ((x + m - 1) // m) * m


# ---------------------------------------------------------------------------
# Tiled matmul + bias (+ optional ReLU) kernel
# ---------------------------------------------------------------------------

def _mm_bias_kernel(a_ref, b_ref, bias_ref, o_ref, acc_ref, *, relu):
    k = pl.program_id(2)

    @pl.when(k == 0)
    def _():
        acc_ref[...] = jnp.zeros_like(acc_ref)

    acc_ref[...] += jnp.dot(a_ref[...], b_ref[...],
                            preferred_element_type=jnp.float32)

    @pl.when(k == pl.num_programs(2) - 1)
    def _():
        r = acc_ref[...] + bias_ref[...]
        if relu:
            r = jnp.maximum(r, 0.0)
        o_ref[...] = r.astype(o_ref.dtype)


def matmul_bias(a, b, bias, *, relu=False, tm_max=256, tn_max=512, tk_max=512):
    """a: (M, K), b: (K, N), bias: (N,) or (1, N) -> (M, N).

    Tiled, pipelined Pallas matmul with lane-dense (128-multiple) padded K/N.
    """
    M, K = a.shape
    K2, N = b.shape
    assert K == K2

    Mp = _round_up(M, 8)
    tm = min(Mp, tm_max)
    Mp = _round_up(M, tm)
    Kp = _round_up(K, 128)
    tk = min(Kp, tk_max)
    Kp = _round_up(K, tk)
    Np = _round_up(N, 128)
    tn = min(Np, tn_max)
    Np = _round_up(N, tn)

    a_p = jnp.pad(a, ((0, Mp - M), (0, Kp - K)))
    b_p = jnp.pad(b, ((0, Kp - K), (0, Np - N)))
    bias_p = jnp.pad(bias.reshape(1, -1), ((0, 0), (0, Np - N)))

    grid = (Mp // tm, Np // tn, Kp // tk)
    out = pl.pallas_call(
        functools.partial(_mm_bias_kernel, relu=relu),
        grid=grid,
        in_specs=[
            pl.BlockSpec((tm, tk), lambda i, j, k: (i, k)),
            pl.BlockSpec((tk, tn), lambda i, j, k: (k, j)),
            pl.BlockSpec((1, tn), lambda i, j, k: (0, j)),
        ],
        out_specs=pl.BlockSpec((tm, tn), lambda i, j, k: (i, j)),
        out_shape=jax.ShapeDtypeStruct((Mp, Np), jnp.float32),
        scratch_shapes=[pltpu.VMEM((tm, tn), jnp.float32)],
        compiler_params=pltpu.CompilerParams(
            dimension_semantics=("parallel", "parallel", "arbitrary"),
            vmem_limit_bytes=32 * 1024 * 1024),
    )(a_p, b_p, bias_p)
    return out[:M, :N]


# ---------------------------------------------------------------------------
# Fused conv3x3 (im2col matmul) + bias + ReLU + 2x2 maxpool kernel
# ---------------------------------------------------------------------------

def _conv_pool_kernel(patch_ref, w_ref, b_ref, o_ref):
    p = pl.program_id(1)
    r = jnp.dot(patch_ref[0], w_ref[...], preferred_element_type=jnp.float32)
    r = jnp.maximum(r + b_ref[...], 0.0)

    @pl.when(p == 0)
    def _():
        o_ref[...] = r

    @pl.when(p > 0)
    def _():
        o_ref[...] = jnp.maximum(o_ref[...], r)


def _im2col_pool_planes(x_nhwc):
    """x: (N, H, W, C) -> (4, N*(H/2)*(W/2), C*9) im2col patches grouped by pool member.

    Plane p holds the 3x3 patches (feature order c*9 + (kh*3+kw), matching the PyTorch
    weight reshape) of the conv-output pixel that is pool-window member p.
    """
    N, H, W, C = x_nhwc.shape
    xp = jnp.pad(x_nhwc, ((0, 0), (1, 1), (1, 1), (0, 0)))
    taps = [xp[:, kh:kh + H, kw:kw + W, :] for kh in range(3) for kw in range(3)]
    patches = jnp.stack(taps, axis=-1)              # (N, H, W, C, 9)
    patches = patches.reshape(N, H, W, C * 9)       # feature = c*9 + k
    planes = jnp.stack([patches[:, 0::2, 0::2, :],
                        patches[:, 0::2, 1::2, :],
                        patches[:, 1::2, 0::2, :],
                        patches[:, 1::2, 1::2, :]], axis=0)
    return planes.reshape(4, N * (H // 2) * (W // 2), C * 9)


def conv3x3_relu_pool(x_nhwc, w, b):
    """x: (N, H, W, C_in) NHWC, w: (C_out, C_in, 3, 3), b: (C_out,)
    -> relu(conv3x3(pad=1)) followed by 2x2/2 maxpool, as (N, H/2, W/2, C_out)."""
    N, H, W, C = x_nhwc.shape
    assert H % 2 == 0 and W % 2 == 0, "maxpool 2x2 expects even spatial dims"
    C_out = w.shape[0]
    K = C * 9

    planes = _im2col_pool_planes(x_nhwc)            # (4, Mp, K)
    Mp = planes.shape[1]
    Kp = _round_up(K, 128)                          # lane-dense K
    Np = _round_up(C_out, 128)                      # lane-dense output (no masked vst)
    Mp_pad = _round_up(Mp, 8)
    tm = min(Mp_pad, 512)
    Mp_pad = _round_up(Mp, tm)

    planes = jnp.pad(planes, ((0, 0), (0, Mp_pad - Mp), (0, Kp - K)))
    w2 = jnp.pad(w.reshape(C_out, K).T, ((0, Kp - K), (0, Np - C_out)))
    b2 = jnp.pad(b.reshape(1, C_out), ((0, 0), (0, Np - C_out)))

    out = pl.pallas_call(
        _conv_pool_kernel,
        grid=(Mp_pad // tm, 4),                     # pool-plane max-reduction axis last
        in_specs=[
            pl.BlockSpec((1, tm, Kp), lambda i, p: (p, i, 0)),
            pl.BlockSpec((Kp, Np), lambda i, p: (0, 0)),
            pl.BlockSpec((1, Np), lambda i, p: (0, 0)),
        ],
        out_specs=pl.BlockSpec((tm, Np), lambda i, p: (i, 0)),
        out_shape=jax.ShapeDtypeStruct((Mp_pad, Np), jnp.float32),
        compiler_params=pltpu.CompilerParams(
            dimension_semantics=("parallel", "arbitrary"),
            vmem_limit_bytes=32 * 1024 * 1024),
    )(planes, w2, b2)

    return out[:Mp, :C_out].reshape(N, H // 2, W // 2, C_out)


# ---------------------------------------------------------------------------
# Fused bidirectional LSTM recurrence kernel (both directions in one call)
# ---------------------------------------------------------------------------

def _bilstm_kernel(xproj_ref, whh_ref, o_ref, hblk_scr, c_scr, *, T, B, H):
    # xproj_ref: (T, B, 8H)   cols [0:4H] = fwd input proj, [4H:8H] = bwd input proj
    # whh_ref:   (2H, 4H)     rows [0:H] = W_hh_f^T, [H:2H] = W_hh_b^T
    # o_ref:     (T, B, 2H)   cols [0:H] = fwd hidden, [H:2H] = bwd hidden
    # hblk_scr:  (2B, 2H)     block-diagonal hidden state (off blocks stay zero)
    # c_scr:     (2B, H)      cell state, rows [0:B]=fwd, [B:2B]=bwd
    hblk_scr[...] = jnp.zeros_like(hblk_scr)
    c_scr[...] = jnp.zeros_like(c_scr)

    @pl.loop(0, T)
    def _(t):
        tb = T - 1 - t
        x_fwd = xproj_ref[t]                                    # (B, 8H)
        x_bwd = xproj_ref[tb]                                   # (B, 8H)
        xcat = jnp.concatenate([x_fwd[:, :4 * H],
                                x_bwd[:, 4 * H:]], axis=0)      # (2B, 4H)
        # block-diagonal recurrent matmul: rows 0:B use W_hh_f, rows B:2B use W_hh_b
        gates = xcat + jnp.dot(hblk_scr[...], whh_ref[...],
                               preferred_element_type=jnp.float32)
        # PyTorch gate order: i, f, g, o
        i_g = jax.nn.sigmoid(gates[:, 0 * H:1 * H])
        f_g = jax.nn.sigmoid(gates[:, 1 * H:2 * H])
        g_g = jnp.tanh(gates[:, 2 * H:3 * H])
        o_g = jax.nn.sigmoid(gates[:, 3 * H:4 * H])
        c_new = f_g * c_scr[...] + i_g * g_g
        h_new = o_g * jnp.tanh(c_new)                           # (2B, H)

        c_scr[...] = c_new
        hblk_scr[0:B, 0:H] = h_new[0:B, :]
        hblk_scr[B:2 * B, H:2 * H] = h_new[B:2 * B, :]

        o_ref[t, :, 0:H] = h_new[0:B, :]
        o_ref[tb, :, H:2 * H] = h_new[B:2 * B, :]


def bilstm_layer(seq, p, hidden=128):
    """seq: (T, B, F) time-major -> (T, B, 2*hidden) time-major (PyTorch bidir LSTM)."""
    T, B, F = seq.shape
    H = hidden

    # One lane-dense input-projection matmul for both directions: (T*B, F) @ (F, 8H).
    w_cat = jnp.concatenate([p["w_ih_f"].T, p["w_ih_b"].T], axis=1)      # (F, 8H)
    b_cat = jnp.concatenate([p["b_ih_f"] + p["b_hh_f"],
                             p["b_ih_b"] + p["b_hh_b"]]).reshape(1, 8 * H)
    xproj = matmul_bias(seq.reshape(T * B, F), w_cat, b_cat)             # (T*B, 8H)
    xproj = xproj.reshape(T, B, 8 * H)                                   # free (time-major)

    whh_cat = jnp.concatenate([p["w_hh_f"].T, p["w_hh_b"].T], axis=0)    # (2H, 4H)

    return pl.pallas_call(
        functools.partial(_bilstm_kernel, T=T, B=B, H=H),
        out_shape=jax.ShapeDtypeStruct((T, B, 2 * H), jnp.float32),
        scratch_shapes=[pltpu.VMEM((2 * B, 2 * H), jnp.float32),
                        pltpu.VMEM((2 * B, H), jnp.float32)],
    )(xproj, whh_cat)


# ---------------------------------------------------------------------------
# Parameters + full forward pass
# ---------------------------------------------------------------------------

def init_params(key, in_ch, img_h, num_classes, hidden=128):
    keys = iter(jax.random.split(key, 32))

    def w(shape, scale=0.05):
        return (scale * jax.random.normal(next(keys), shape)).astype(jnp.float32)

    params = {
        "conv1_w": w((32, in_ch, 3, 3)), "conv1_b": w((32,)),
        "conv2_w": w((64, 32, 3, 3)),    "conv2_b": w((64,)),
        "fc_w": w((num_classes + 1, 2 * hidden)), "fc_b": w((num_classes + 1,)),
    }
    lstm_inputs = [64 * (img_h // 4), 2 * hidden]
    for li, fin in enumerate(lstm_inputs, start=1):
        params[f"lstm{li}"] = {
            "w_ih_f": w((4 * hidden, fin)), "w_hh_f": w((4 * hidden, hidden)),
            "b_ih_f": w((4 * hidden,)),     "b_hh_f": w((4 * hidden,)),
            "w_ih_b": w((4 * hidden, fin)), "w_hh_b": w((4 * hidden, hidden)),
            "b_ih_b": w((4 * hidden,)),     "b_hh_b": w((4 * hidden,)),
        }
    return params


def crnn_forward(params, x, hidden=128):
    """x: (bs, C_in, H, W) NCHW -> (W//4, bs, num_classes+1), like the PyTorch module."""
    N, C, H, W = x.shape
    x_nhwc = x.transpose(0, 2, 3, 1)                                     # (N, H, W, C)

    a1 = conv3x3_relu_pool(x_nhwc, params["conv1_w"], params["conv1_b"])  # (N, H/2, W/2, 32)
    a2 = conv3x3_relu_pool(a1, params["conv2_w"], params["conv2_b"])      # (N, H/4, W/4, 64)

    H4, W4 = H // 4, W // 4
    # PyTorch: permute(0,3,1,2).view(bs, W', 64*H') -> here produced directly time-major.
    seq = a2.transpose(2, 0, 3, 1).reshape(W4, N, 64 * H4)               # (T, B, F)

    seq = bilstm_layer(seq, params["lstm1"], hidden)                     # (T, B, 2H)
    seq = bilstm_layer(seq, params["lstm2"], hidden)                     # (T, B, 2H)

    T, B, F = seq.shape
    logits = matmul_bias(seq.reshape(T * B, F), params["fc_w"].T,
                         params["fc_b"])                                 # (T*B, NC+1)
    # Already time-major: PyTorch's final permute(1,0,2) is a free reshape here.
    return logits.reshape(T, B, -1)


if __name__ == "__main__":
    key = jax.random.PRNGKey(0)
    kx, kp = jax.random.split(key)

    # configs: INPUT_CHANNELS=4, IMAGE_HEIGHT=16, IMAGE_WIDTH=16, NUM_CLASSES=10
    B, C, H, W = 2, 4, 16, 16
    NUM_CLASSES = 10

    x = jax.random.normal(kx, (B, C, H, W), dtype=jnp.float32)
    params = init_params(kp, C, H, NUM_CLASSES)

    out = crnn_forward(params, x)
    out = jax.block_until_ready(out)
    assert out.shape == (W // 4, B, NUM_CLASSES + 1), out.shape
    assert bool(jnp.all(jnp.isfinite(out)))
    print("KERNEL_OK")
</pallas_src>

<mosaic_0001>
module attributes {stable_mosaic.version = 11 : i64} {
  func.func @_conv_pool_kernel(%arg0: i32, %arg1: i32, %arg2: memref<1x128x128xf32, #tpu.memory_space<vmem>>, %arg3: memref<128x128xf32, #tpu.memory_space<vmem>>, %arg4: memref<1x128xf32, #tpu.memory_space<vmem>>, %arg5: memref<128x128xf32, #tpu.memory_space<vmem>>) attributes {dimension_semantics = [#tpu.dimension_semantics<parallel>, #tpu.dimension_semantics<arbitrary>], iteration_bounds = array<i64: 1, 4>, scalar_prefetch = 0 : i64, scratch_operands = 0 : i64, tpu.core_type = #tpu.core_type<tc>, window_params = [{transform_indices = @transform_0, window_bounds = array<i64: 1, 128, 128>}, {pipeline_mode = #tpu.pipeline_mode<synchronous>, transform_indices = @transform_1, window_bounds = array<i64: 128, 128>}, {pipeline_mode = #tpu.pipeline_mode<synchronous>, transform_indices = @transform_2, window_bounds = array<i64: 1, 128>}, {transform_indices = @transform_3, window_bounds = array<i64: 128, 128>}]} {
    %c0 = arith.constant 0 : index
    %c0_0 = arith.constant 0 : index
    %c0_1 = arith.constant 0 : index
    %0 = vector.load %arg2[%c0, %c0_0, %c0_1] : memref<1x128x128xf32, #tpu.memory_space<vmem>>, vector<1x128x128xf32>
    %1 = vector.shape_cast %0 : vector<1x128x128xf32> to vector<128x128xf32>
    %c0_2 = arith.constant 0 : index
    %c0_3 = arith.constant 0 : index
    %2 = vector.load %arg3[%c0_2, %c0_3] : memref<128x128xf32, #tpu.memory_space<vmem>>, vector<128x128xf32>
    %cst = arith.constant dense<0.000000e+00> : vector<128x128xf32>
    %3 = tpu.matmul %1, %2, %cst {dimension_numbers = #tpu.dot_dimension_numbers<[1], [0], [0], [1], [0, 0, 1, 1], [], []>} : vector<128x128xf32>, vector<128x128xf32>, vector<128x128xf32> -> vector<128x128xf32>
    %c0_4 = arith.constant 0 : index
    %c0_5 = arith.constant 0 : index
    %4 = vector.load %arg4[%c0_4, %c0_5] : memref<1x128xf32, #tpu.memory_space<vmem>>, vector<1x128xf32>
    %5 = vector.broadcast %4 : vector<1x128xf32> to vector<128x128xf32>
    %6 = arith.addf %3, %5 : vector<128x128xf32>
    %cst_6 = arith.constant 0.000000e+00 : f32
    %7 = vector.broadcast %cst_6 : f32 to vector<128x128xf32>
    %8 = arith.maximumf %6, %7 : vector<128x128xf32>
    %c0_i32 = arith.constant 0 : i32
    %9 = arith.cmpi eq, %arg1, %c0_i32 : i32
    %10 = arith.extui %9 : i1 to i32
    %c0_i32_7 = arith.constant 0 : i32
    %11 = arith.cmpi ne, %10, %c0_i32_7 : i32
    scf.if %11 {
      %c0_10 = arith.constant 0 : index
      %c0_11 = arith.constant 0 : index
      %15 = vector.load %arg5[%c0_10, %c0_11] : memref<128x128xf32, #tpu.memory_space<vmem>>, vector<128x128xf32>
      tpu.vector_store %arg5[%c0_10, %c0_11], %8 {strides = array<i32>} : memref<128x128xf32, #tpu.memory_space<vmem>>, vector<128x128xf32>,
    } else {
    }
    %c0_i32_8 = arith.constant 0 : i32
    %12 = arith.cmpi sgt, %arg1, %c0_i32_8 : i32
    %13 = arith.extui %12 : i1 to i32
    %c0_i32_9 = arith.constant 0 : i32
    %14 = arith.cmpi ne, %13, %c0_i32_9 : i32
    scf.if %14 {
      %c0_10 = arith.constant 0 : index
      %c0_11 = arith.constant 0 : index
      %15 = vector.load %arg5[%c0_10, %c0_11] : memref<128x128xf32, #tpu.memory_space<vmem>>, vector<128x128xf32>
      %16 = arith.maximumf %15, %8 : vector<128x128xf32>
      %c0_12 = arith.constant 0 : index
      %c0_13 = arith.constant 0 : index
      %17 = vector.load %arg5[%c0_12, %c0_13] : memref<128x128xf32, #tpu.memory_space<vmem>>, vector<128x128xf32>
      tpu.vector_store %arg5[%c0_12, %c0_13], %16 {strides = array<i32>} : memref<128x128xf32, #tpu.memory_space<vmem>>, vector<128x128xf32>,
    } else {
    }
    return
  }
  func.func @transform_0(%arg0: i32, %arg1: i32) -> (i32, i32, i32) {
    %c0_i32 = arith.constant 0 : i32
    %c0_i32_0 = arith.constant 0 : i32
    return %arg1, %arg0, %c0_i32 : i32, i32, i32
  }
  func.func @transform_1(%arg0: i32, %arg1: i32) -> (i32, i32) {
    %c0_i32 = arith.constant 0 : i32
    %c0_i32_0 = arith.constant 0 : i32
    %c0_i32_1 = arith.constant 0 : i32
    return %c0_i32, %c0_i32_0 : i32, i32
  }
  func.func @transform_2(%arg0: i32, %arg1: i32) -> (i32, i32) {
    %c0_i32 = arith.constant 0 : i32
    %c0_i32_0 = arith.constant 0 : i32
    %c0_i32_1 = arith.constant 0 : i32
    return %c0_i32, %c0_i32_0 : i32, i32
  }
  func.func @transform_3(%arg0: i32, %arg1: i32) -> (i32, i32) {
    %c0_i32 = arith.constant 0 : i32
    %c0_i32_0 = arith.constant 0 : i32
    return %arg0, %c0_i32 : i32, i32
  }
}

</mosaic_0001>

<bundles_post_ra>
// kernel: tpu_custom_call.1
= control target key start
LH: loop header
LB: loop body
LE: loop exit
PB: predicated region body
PF: predicated region fallthrough
CT: control target
= control target key end

     0   :  { %8 = vsyncpa [#allocation3], 0  ;;  %s1252_s0 = inlined_call_operand.hbm [shape: f32[4,128,128], index: 0, kind: input, shape index: {}]   ;;  %s1253_s1 = inlined_call_operand.hbm [shape: f32[128,128], index: 1, kind: input, shape index: {}]   ;;  %s1254_s2 = inlined_call_operand.vmem [shape: f32[1,128], index: 2, kind: input, shape index: {}]   ;;  %s1255_s3 = inlined_call_operand.hbm [shape: f32[128,128], index: 3, kind: output, shape index: {}]  }
   0x1   :  { %10 = vsyncpa [#allocation3 + $0x1], 0 }
   0x2   :  { %11 = vsyncpa [#allocation6], 0 }
   0x3   :  { %12 = vsyncpa [#allocation4], 0  ;;  %s975_s12 = smov 0   ;;  %s977_s13 = smov 0  }
   0x4   :  { %s979_s14 = smov 0   ;;  %s981_s15 = smov 0  }
   0x5   :  { %s983_s16 = smov 0   ;;  %s985_s17 = smov 0  }
   0x6 LB: > { %s573_s18 = sadd.s32 4294967295, %s946_s17   ;;  %p52_p0 = scmp.ne.s32.totalorder %s930_s13, %s926_s12  ;;  %s946_s17 = sphi %s985_s17, %s18_s17   ;;  %s942_s16 = sphi %s983_s16, %s1273_s16   ;;  %s938_s15 = sphi %s981_s15, %s1272_s15   ;;  %s934_s14 = sphi %s979_s14, %s1271_s14   ;;  %s930_s13 = sphi %s977_s13, %s1270_s13   ;;  %s926_s12 = sphi %s975_s12, %s1269_s12  }
   0x7   : > { %p1007_p1 = scmp.eq.s32.totalorder %s573_s18, 0  ;;  %p574_p2 = scmp.ge.s32.totalorder %s946_s17, 1 }
   0x8   : > { %p131_p3 = scmp.lt.s32.totalorder %s946_s17, 5  ;;  %s948_s22 = smov [#allocation5]  }
   0x9   : > { %s1260_s19 = scalar_select %p1007_p1, 1, 0 }
   0xa   : > { %p1015_p4 = por %p1007_p1, %p52_p0  ;;  %p1019_p5 = pnand %p574_p2, %p131_p3 }
   0xb   : > { %s143_s23 = sshll.u32 %s948_s22, 4  ;;  %s27_s25 = sadd.s32 1, %s942_s16  ;;  %s144_s23 = int_to_ptr.vmem [resolvable:$true] %s143_s23 }
   0xc   : > { %s1261_s20 = scalar_select %p1015_p4, 1, 0 }
   0xd   : > { %s1262_s21 = scalar_select %p1019_p5, 1, 0 }
   0xe   : > { %p737_p6 = pneg %p1019_p5  ;;  %s804_s28 = scalar_lea.hbm %s1253_s1, 2048 }
   0xf   : > { %p805_p8 = scmp.ne.s32.totalorder %s1253_s1, %s804_s28  ;;  %p811_p12 = scmp.lt.u32.totalorder %s804_s28, %s1253_s1 }
  0x10   : > { %p1027_p7 = pnand %p737_p6, %p1007_p1 }
  0x12   : > { %p806_p9 = pneg %p1027_p7 }
  0x14   : > { %p807_p10 = pnand %p806_p9, %p805_p8 }
  0x16   : > { %p808_p11 = pneg %p807_p10 }
  0x18   : > { %p813_p13 = pnand %p811_p12, %p808_p11 }
  0x1a   : > { %816 = shalt.err (!%p813_p13)
}
  0x1b   : > { %s817_s6 = scalar_lea.vmem %s144_s23, 2048  ;;  %p825_p6 = scmp.lt.s32.totalorder %s144_s23, %s144_s23 }
  0x1c   : > { %p818_p0 = scmp.ne.s32.totalorder %s144_s23, %s817_s6  ;;  %p826_p1 = scmp.lt.s32.totalorder %s817_s6, %s817_s6 }
  0x1e   : > { %p820_p2 = pnand %p818_p0, %p806_p9  ;;  %p827_p4 = por %p826_p1, %p825_p6 }
  0x20   : > { %p821_p3 = pneg %p820_p2 }
  0x22   : > { %p828_p5 = pnand %p827_p4, %p821_p3 }
  0x24   : > { %831 = shalt.err (!%p828_p5)
}
  0x25   : > { %s949_s7 = smov 128   ;;  %s950_s8 = smov 8  }
  0x26   : > { %740 = dma.hbm_to_vmem [thread:$0]  (!%p1027_p7), %s1253_s1, 2048, %s144_s23, [#allocation6], %s949_s7, %s949_s7, %s950_s8  }
  0x27   : > { %p28_p1 = scmp.ge.s32.totalorder %s27_s25, 4  ;;  %s39_s11 = sadd.s32 1, %s934_s14 }
  0x28   : > { %p46_p4 = scmp.ne.s32.totalorder %s934_s14, %s930_s13  ;;  %p47_p5 = scmp.eq.s32.totalorder %s946_s17, 0 }
  0x29   : > { %s1275_s25 = smov (%p28_p1, %s27_s25), 0  ;;  %p746_p9 = scmp.lt.s32.totalorder %s946_s17, 4 }
  0x2a   : > { %p48_p8 = por %p47_p5, %p46_p4  ;;  %s34_s12 = ssub.s32 %s942_s16, %s1275_s25 }
  0x2b   : > { %s160_s22 = sand.u32 1, %s934_s14   ;;  %p37_p10 = scmp.eq.s32.totalorder %s34_s12, 0 }
  0x2c   : > { %s577_s24 = sshll.u32 %s160_s22, 7  ;;  %s590_s26 = sshll.u32 %s942_s16, 11 }
  0x2d   : > { %s1063_s27 = scalar_select %p37_p10, %s934_s14, %s39_s11  }
  0x2e   : > { %s1068_s23 = scalar_lea.hbm %s1252_s0, %s590_s26  ;;  %s164_s30 = scalar_lea.vmem [#allocation2], %s577_s24 }
  0x2f   : > { %s173_s4 = sshll.u32 %s164_s30, 4  ;;  %p1070_p7 = pnand %p746_p9, %p48_p8  ;;  %s1074_s4 = int_to_ptr.vmem [resolvable:$true] %s173_s4 }
  0x30   : > { %s1076_s6 = scalar_lea.sflag [#allocation3], %s160_s22  ;;  %s832_s9 = scalar_lea.hbm %s1068_s23, 2048 }
  0x31   : > { %p833_p11 = scmp.ne.s32.totalorder %s1068_s23, %s832_s9  ;;  %p834_p12 = pneg %p1070_p7 }
  0x32   : > { %s837_s12 = scalar_lea.hbm %s1252_s0, 8192  ;;  %p838_p2 = scmp.lt.u32.totalorder %s1068_s23, %s1252_s0 }
  0x33   : > { %p835_p13 = pnand %p834_p12, %p833_p11  ;;  %p839_p3 = scmp.lt.u32.totalorder %s837_s12, %s832_s9 }
  0x34   : > { %p841_p1 = scmp.lt.u32.totalorder %s832_s9, %s1068_s23 }
  0x35   : > { %p836_p0 = pneg %p835_p13  ;;  %p840_p6 = por %p839_p3, %p838_p2 }
  0x37   : > { %p842_p4 = por %p841_p1, %p840_p6 }
  0x39   : > { %p843_p5 = pnand %p842_p4, %p836_p0 }
  0x3b   : > { %846 = shalt.err (!%p843_p5)
}
  0x3c   : > { %s847_s22 = scalar_lea.vmem %s1074_s4, 2048  ;;  %s951_s28 = smov [#allocation2]  }
  0x3d   : > { %p848_p8 = scmp.ne.s32.totalorder %s1074_s4, %s847_s22  ;;  %s852_s29 = sshll.u32 %s951_s28, 4  ;;  %s853_s29 = int_to_ptr.vmem [resolvable:$false] %s852_s29 }
  0x3e   : > { %s854_s30 = scalar_lea.vmem %s853_s29, 4096  ;;  %p855_p11 = scmp.lt.s32.totalorder %s1074_s4, %s853_s29 }
  0x3f   : > { %p850_p9 = pnand %p848_p8, %p834_p12  ;;  %p856_p13 = scmp.lt.s32.totalorder %s854_s30, %s847_s22 }
  0x41   : > { %p851_p10 = pneg %p850_p9  ;;  %p857_p2 = por %p856_p13, %p855_p11 }
  0x43   : > { %p858_p3 = pnand %p857_p2, %p851_p10 }
  0x45   : > { %861 = shalt.err (!%p858_p3)
}
  0x46   : > { %744 = dma.hbm_to_vmem [thread:$0]  (!%p1070_p7), %s1068_s23, 2048, %s1074_s4, %s1076_s6, %s949_s7, %s949_s7, %s950_s8  }
  0x47   : > { %p1265_p12 = scmp.ne.s32.totalorder %s1262_s21, 0 }
  0x48   : > { %s187_s9 = sand.u32 (!%p1265_p12), 1, %s930_s13   ;;  %p1266_p0 = scmp.ne.s32.totalorder (!%p1265_p12), %s1261_s20, 0 }
  0x49   : > { %185 = sbr.rel (%p1265_p12) target bundleno = 387 (0x183), region = 32  ;;  %s581_s10 = sshll.u32 (!%p1265_p12), %s187_s9, 7 }
  0x4a   : > { %s188_s11 = scalar_lea.sflag (!%p1265_p12), [#allocation3], %s187_s9  ;;  %s1110_s12 = scalar_lea.vmem (!%p1265_p12), [#allocation2], %s581_s10 }
  0x50   : > { %913 = dma.done.wait (%p1266_p0), %s188_s11, 2048  }
  0x51   : > { %915 = vsyncadd (%p1266_p0), %s188_s11, 4294965248  ;;  %p1267_p6 = scmp.ne.s32.totalorder %s1260_s19, 0 }
  0x53   : > { %917 = dma.done.wait (%p1267_p6), [#allocation6], 2048  }
  0x54   : > { %919 = vsyncadd (%p1267_p6), [#allocation6], 4294965248  ;;  %v231_v0 = vld [vmem:[#allocation5] sm:$0xff]  ;;  %v232_v1 = vld [vmem:[#allocation5 + $0x8] sm:$0xff]  ;;  %p584_p7 = scmp.ne.s32.totalorder %s938_s15, 0 }
  0x55   : > { %v233_v2 = vld [vmem:[#allocation5 + $0x10] sm:$0xff]  ;;  %v679_v3 = vpack.c.bf16 %v232_v1, %v231_v0  ;;  %v234_v4 = vld [vmem:[#allocation5 + $0x18] sm:$0xff]  ;;  %v235_v6 = vld [vmem:[#allocation5 + $0x20] sm:$0xff] }
  0x56   : > { %v683_v5 = vpack.c.bf16 %v234_v4, %v233_v2  ;;  %v236_v7 = vld [vmem:[#allocation5 + $0x28] sm:$0xff]  ;;  %v215_v9 = vld [vmem:[%s1110_s12] sm:$0xff]  ;;  %v237_v11 = vld [vmem:[#allocation5 + $0x30] sm:$0xff] }
  0x57   : > { %680 = vmatprep.subr.bf16.mxu0 %v679_v3  ;;  %711 = vmatprep.subr.bf16.mxu1 %v679_v3  ;;  %v687_v8 = vpack.c.bf16 %v236_v7, %v235_v6  ;;  %v223_v10 = vld [vmem:[%s1110_s12 + $0x40] sm:$0xff]  ;;  %v238_v12 = vld [vmem:[#allocation5 + $0x38] sm:$0xff]  ;;  %v240_v15 = vld [vmem:[#allocation5 + $0x48] sm:$0xff] }
  0x58   : > { %682 = vmatpush3.bf16.msra.mxu0 %v679_v3  ;;  %719 = vmatpush3.bf16.msra.mxu1 %v679_v3  ;;  %v691_v13 = vpack.c.bf16 %v238_v12, %v237_v11  ;;  %v239_v14 = vld [vmem:[#allocation5 + $0x40] sm:$0xff]  ;;  %v241_v17 = vld [vmem:[#allocation5 + $0x50] sm:$0xff]  ;;  %v242_v18 = vld [vmem:[#allocation5 + $0x58] sm:$0xff] }
  0x59   : > { %684 = vmatprep.subr.bf16.mxu0 %v683_v5  ;;  %712 = vmatprep.subr.bf16.mxu1 %v683_v5  ;;  %v695_v16 = vpack.c.bf16 %v240_v15, %v239_v14  ;;  %v699_v19 = vpack.c.bf16 %v242_v18, %v241_v17  ;;  %v243_v20 = vld [vmem:[#allocation5 + $0x60] sm:$0xff]  ;;  %v244_v21 = vld [vmem:[#allocation5 + $0x68] sm:$0xff]  ;;  %v245_v23 = vld [vmem:[#allocation5 + $0x70] sm:$0xff] }
  0x5a   : > { %655 = vmatprep.mubr.f32.mxu0 %v215_v9  ;;  %667 = vmatprep.mubr.f32.mxu1 %v223_v10  ;;  %v703_v22 = vpack.c.bf16 %v244_v21, %v243_v20  ;;  %v246_v24 = vld [vmem:[#allocation5 + $0x78] sm:$0xff]  ;;  %v216_v26 = vld [vmem:[%s1110_s12 + $0x8] sm:$0xff]  ;;  %v217_v28 = vld [vmem:[%s1110_s12 + $0x10] sm:$0xff] }
  0x5b   : > { %v707_v25 = vpack.c.bf16 %v246_v24, %v245_v23  ;;  %v224_v27 = vld [vmem:[%s1110_s12 + $0x48] sm:$0xff]  ;;  %v225_v29 = vld [vmem:[%s1110_s12 + $0x50] sm:$0xff]  ;;  %v218_v30 = vld [vmem:[%s1110_s12 + $0x18] sm:$0xff] }
  0x5c   : > { %686 = vmatpush3.bf16.msra.mxu0 %v683_v5  ;;  %720 = vmatpush3.bf16.msra.mxu1 %v683_v5  ;;  %v226_v31 = vld [vmem:[%s1110_s12 + $0x58] sm:$0xff]  ;;  %v219_v32 = vld [vmem:[%s1110_s12 + $0x20] sm:$0xff]  ;;  %v220_v34 = vld [vmem:[%s1110_s12 + $0x28] sm:$0xff] }
  0x5d   : > { %688 = vmatprep.subr.bf16.mxu0 %v687_v8  ;;  %713 = vmatprep.subr.bf16.mxu1 %v687_v8  ;;  %v227_v33 = vld [vmem:[%s1110_s12 + $0x60] sm:$0xff]  ;;  %v228_v35 = vld [vmem:[%s1110_s12 + $0x68] sm:$0xff]  ;;  %v221_v36 = vld [vmem:[%s1110_s12 + $0x30] sm:$0xff] }
  0x5e   : > { %v229_v37 = vld [vmem:[%s1110_s12 + $0x70] sm:$0xff]  ;;  %v222_v38 = vld [vmem:[%s1110_s12 + $0x38] sm:$0xff]  ;;  %v583_v40 = vld [vmem:[%s1254_s2] ss:$0 sm:$0xff] }
  0x5f   : > { %v230_v39 = vld [vmem:[%s1110_s12 + $0x78] sm:$0xff] }
  0x60   : > { %690 = vmatpush3.bf16.msra.mxu0 %v687_v8  ;;  %721 = vmatpush3.bf16.msra.mxu1 %v687_v8 }
  0x61   : > { %692 = vmatprep.subr.bf16.mxu0 %v691_v13  ;;  %714 = vmatprep.subr.bf16.mxu1 %v691_v13 }
  0x64   : > { %694 = vmatpush3.bf16.msra.mxu0 %v691_v13  ;;  %722 = vmatpush3.bf16.msra.mxu1 %v691_v13 }
  0x65   : > { %696 = vmatprep.subr.bf16.mxu0 %v695_v16  ;;  %715 = vmatprep.subr.bf16.mxu1 %v695_v16 }
  0x68   : > { %698 = vmatpush3.bf16.msra.mxu0 %v695_v16  ;;  %723 = vmatpush3.bf16.msra.mxu1 %v695_v16 }
  0x69   : > { %700 = vmatprep.subr.bf16.mxu0 %v699_v19  ;;  %716 = vmatprep.subr.bf16.mxu1 %v699_v19 }
  0x6c   : > { %702 = vmatpush3.bf16.msra.mxu0 %v699_v19  ;;  %724 = vmatpush3.bf16.msra.mxu1 %v699_v19 }
  0x6d   : > { %704 = vmatprep.subr.bf16.mxu0 %v703_v22  ;;  %717 = vmatprep.subr.bf16.mxu1 %v703_v22 }
  0x70   : > { %706 = vmatpush3.bf16.msra.mxu0 %v703_v22  ;;  %725 = vmatpush3.bf16.msra.mxu1 %v703_v22 }
  0x71   : > { %708 = vmatprep.subr.bf16.mxu0 %v707_v25  ;;  %718 = vmatprep.subr.bf16.mxu1 %v707_v25 }
  0x74   : > { %710 = vmatpush3.bf16.msra.mxu0 %v707_v25  ;;  %726 = vmatpush3.bf16.msra.mxu1 %v707_v25 }
  0x77   : > { %656 = vmatmul.mubr.f32.vlgmr.msra.gmra.mrb[0].mxu0 %v216_v26  ;;  %668 = vmatmul.mubr.f32.vlgmr.msra.gmra.mrb[0].mxu1 %v224_v27 }
  0x78   : > { %658 = vmatprep.mubr.f32.mxu0 %v217_v28  ;;  %670 = vmatprep.mubr.f32.mxu1 %v225_v29 }
  0x7b   : > { %659 = vmatmul.mubr.f32.gmra.mrb[2].mxu0 %v218_v30  ;;  %671 = vmatmul.mubr.f32.gmra.mrb[2].mxu1 %v226_v31 }
  0x7c   : > { %661 = vmatprep.mubr.f32.mxu0 %v219_v32  ;;  %673 = vmatprep.mubr.f32.mxu1 %v227_v33 }
  0x7f   : > { %662 = vmatmul.mubr.f32.gmra.mrb[4].mxu0 %v220_v34  ;;  %674 = vmatmul.mubr.f32.gmra.mrb[4].mxu1 %v228_v35 }
  0x80   : > { %664 = vmatprep.mubr.f32.mxu0 %v221_v36  ;;  %676 = vmatprep.mubr.f32.mxu1 %v229_v37 }
  0x83   : > { %665 = vmatmul.mubr.f32.gmra.mrb[6].mxu0 %v222_v38  ;;  %677 = vmatmul.mubr.f32.gmra.mrb[6].mxu1 %v230_v39 }
 0x14a   : > { %v657_v41 = vpop.f32.mrb[0].mxu0  ;;  %v669_v42 = vpop.f32.mrb[0].mxu1 }
 0x14b   : > { %v1139_v43 = vadd.f32 %v657_v41, %v583_v40  ;;  %v1141_v44 = vadd.f32 %v669_v42, %v583_v40  ;;  %v320_v45 = vpop.f32.mrb[1].mxu0  ;;  %v360_v46 = vpop.f32.mrb[1].mxu1 }
 0x14c   : > { %v1143_v47 = vadd.f32 %v583_v40, %v320_v45  ;;  %v1145_v48 = vadd.f32 %v583_v40, %v360_v46 }
 0x14d   : > { %v400_v49 = vmax.f32 %v1139_v43, 0.0  ;;  %v408_v50 = vmax.f32 %v1141_v44, 0.0 }
 0x14e   : > { %v399_v51 = vmax.f32 %v1143_v47, 0.0  ;;  %v407_v52 = vmax.f32 %v1145_v48, 0.0  ;;  %v660_v53 = vpop.f32.mrb[2].mxu0  ;;  %v672_v54 = vpop.f32.mrb[2].mxu1 }
 0x14f   : > { %v1151_v55 = vadd.f32 %v660_v53, %v583_v40  ;;  %v1153_v56 = vadd.f32 %v672_v54, %v583_v40  ;;  %v330_v57 = vpop.f32.mrb[3].mxu0  ;;  %v370_v58 = vpop.f32.mrb[3].mxu1  ;;  %420 = vst [vmem:[#allocation7 + $0x8] sm:$0xff] (!%p584_p7), %v400_v49  ;;  %428 = vst [vmem:[#allocation7 + $0x48] sm:$0xff] (!%p584_p7), %v408_v50 }
 0x150   : > { %v331_v59 = vadd.f32 %v583_v40, %v330_v57  ;;  %v1155_v60 = vadd.f32 %v583_v40, %v370_v58  ;;  %419 = vst [vmem:[#allocation7] sm:$0xff] (!%p584_p7), %v399_v51  ;;  %427 = vst [vmem:[#allocation7 + $0x40] sm:$0xff] (!%p584_p7), %v407_v52 }
 0x151   : > { %v402_v61 = vmax.f32 %v1151_v55, 0.0  ;;  %v410_v62 = vmax.f32 %v1153_v56, 0.0 }
 0x152   : > { %v401_v63 = vmax.f32 %v331_v59, 0.0  ;;  %v409_v0 = vmax.f32 %v1155_v60, 0.0  ;;  %v663_v1 = vpop.f32.mrb[4].mxu0  ;;  %v675_v2 = vpop.f32.mrb[4].mxu1 }
 0x153   : > { %v346_v3 = vadd.f32 %v663_v1, %v583_v40  ;;  %v1160_v4 = vadd.f32 %v675_v2, %v583_v40  ;;  %v340_v5 = vpop.f32.mrb[5].mxu0  ;;  %v380_v6 = vpop.f32.mrb[5].mxu1  ;;  %422 = vst [vmem:[#allocation7 + $0x18] sm:$0xff] (!%p584_p7), %v402_v61  ;;  %430 = vst [vmem:[#allocation7 + $0x58] sm:$0xff] (!%p584_p7), %v410_v62 }
 0x154   : > { %v341_v7 = vadd.f32 %v583_v40, %v340_v5  ;;  %v1162_v8 = vadd.f32 %v583_v40, %v380_v6  ;;  %418 = sbr.rel (%p584_p7) target bundleno = 349 (0x15d), region = 44  ;;  %421 = vst [vmem:[#allocation7 + $0x10] sm:$0xff] (!%p584_p7), %v401_v63  ;;  %429 = vst [vmem:[#allocation7 + $0x50] sm:$0xff] (!%p584_p7), %v409_v0 }
 0x155   : > { %v404_v9 = vmax.f32 %v346_v3, 0.0  ;;  %v412_v10 = vmax.f32 %v1160_v4, 0.0 }
 0x156   : > { %v403_v11 = vmax.f32 %v341_v7, 0.0  ;;  %v411_v12 = vmax.f32 %v1162_v8, 0.0  ;;  %v666_v13 = vpop.f32.mrb[6].mxu0  ;;  %v678_v14 = vpop.f32.mrb[6].mxu1 }
 0x157   : > { %v356_v15 = vadd.f32 %v666_v13, %v583_v40  ;;  %v1166_v16 = vadd.f32 %v678_v14, %v583_v40  ;;  %v350_v17 = vpop.f32.mrb[7].mxu0  ;;  %v390_v18 = vpop.f32.mrb[7].mxu1  ;;  %424 = vst [vmem:[#allocation7 + $0x28] sm:$0xff] (!%p584_p7), %v404_v9  ;;  %432 = vst [vmem:[#allocation7 + $0x68] sm:$0xff] (!%p584_p7), %v412_v10 }
 0x158   : > { %v351_v19 = vadd.f32 %v583_v40, %v350_v17  ;;  %v1168_v20 = vadd.f32 %v583_v40, %v390_v18  ;;  %423 = vst [vmem:[#allocation7 + $0x20] sm:$0xff] (!%p584_p7), %v403_v11  ;;  %431 = vst [vmem:[#allocation7 + $0x60] sm:$0xff] (!%p584_p7), %v411_v12 }
 0x159   : > { %v406_v21 = vmax.f32 %v356_v15, 0.0  ;;  %v414_v22 = vmax.f32 %v1166_v16, 0.0 }
 0x15a   : > { %v405_v23 = vmax.f32 %v351_v19, 0.0  ;;  %v413_v24 = vmax.f32 %v1168_v20, 0.0 }
 0x15b   : > { %426 = vst [vmem:[#allocation7 + $0x38] sm:$0xff] %v406_v21  ;;  %434 = vst [vmem:[#allocation7 + $0x78] sm:$0xff] %v414_v22 }
 0x15c   : > { %425 = vst [vmem:[#allocation7 + $0x30] sm:$0xff] %v405_v23  ;;  %433 = vst [vmem:[#allocation7 + $0x70] sm:$0xff] %v413_v24 }
 0x15d PF: > { %p585_p1 = scmp.le.s32.totalorder %s938_s15, 0 }
 0x15e   : > { %v439_v25 = vld [vmem:[#allocation7] sm:$0xff] (!%p585_p1)  ;;  %v440_v26 = vld [vmem:[#allocation7 + $0x8] sm:$0xff] (!%p585_p1)  ;;  %v441_v27 = vld [vmem:[#allocation7 + $0x10] sm:$0xff] (!%p585_p1) }
 0x15f   : > { %438 = sbr.rel (%p585_p1) target bundleno = 361 (0x169), region = 48  ;;  %v455_v28 = vmax.f32 (!%p585_p1), %v439_v25, %v399_v51  ;;  %v456_v29 = vmax.f32 (!%p585_p1), %v440_v26, %v400_v49  ;;  %v457_v30 = vmax.f32 (!%p585_p1), %v441_v27, %v401_v63  ;;  %v442_v31 = vld [vmem:[#allocation7 + $0x18] sm:$0xff] (!%p585_p1)  ;;  %v447_v39 = vld [vmem:[#allocation7 + $0x40] sm:$0xff] (!%p585_p1)  ;;  %v448_v43 = vld [vmem:[#allocation7 + $0x48] sm:$0xff] (!%p585_p1) }
 0x160   : > { %v444_v33 = vld [vmem:[#allocation7 + $0x28] sm:$0xff] (!%p585_p1)  ;;  %v458_v34 = vmax.f32 (!%p585_p1), %v442_v31, %v402_v61  ;;  %v463_v42 = vmax.f32 (!%p585_p1), %v447_v39, %v407_v52  ;;  %v449_v45 = vld [vmem:[#allocation7 + $0x50] sm:$0xff] (!%p585_p1)  ;;  %v450_v46 = vld [vmem:[#allocation7 + $0x58] sm:$0xff] (!%p585_p1)  ;;  %v464_v47 = vmax.f32 (!%p585_p1), %v448_v43, %v408_v50 }
 0x161   : > { %v443_v32 = vld [vmem:[#allocation7 + $0x20] sm:$0xff] (!%p585_p1)  ;;  %v460_v36 = vmax.f32 (!%p585_p1), %v444_v33, %v404_v9  ;;  %471 = vst [vmem:[#allocation7] sm:$0xff] (!%p585_p1), %v455_v28  ;;  %472 = vst [vmem:[#allocation7 + $0x8] sm:$0xff] (!%p585_p1), %v456_v29  ;;  %v465_v49 = vmax.f32 (!%p585_p1), %v449_v45, %v409_v0  ;;  %v466_v51 = vmax.f32 (!%p585_p1), %v450_v46, %v410_v62  ;;  %v452_v54 = vld [vmem:[#allocation7 + $0x68] sm:$0xff] (!%p585_p1) }
 0x162   : > { %v459_v35 = vmax.f32 (!%p585_p1), %v443_v32, %v403_v11  ;;  %473 = vst [vmem:[#allocation7 + $0x10] sm:$0xff] (!%p585_p1), %v457_v30  ;;  %474 = vst [vmem:[#allocation7 + $0x18] sm:$0xff] (!%p585_p1), %v458_v34  ;;  %v451_v53 = vld [vmem:[#allocation7 + $0x60] sm:$0xff] (!%p585_p1)  ;;  %v468_v52 = vmax.f32 (!%p585_p1), %v452_v54, %v412_v10 }
 0x163   : > { %v445_v37 = vld [vmem:[#allocation7 + $0x30] sm:$0xff] (!%p585_p1)  ;;  %476 = vst [vmem:[#allocation7 + $0x28] sm:$0xff] (!%p585_p1), %v460_v36  ;;  %479 = vst [vmem:[#allocation7 + $0x40] sm:$0xff] (!%p585_p1), %v463_v42  ;;  %v467_v48 = vmax.f32 (!%p585_p1), %v451_v53, %v411_v12 }
 0x164   : > { %v446_v38 = vld [vmem:[#allocation7 + $0x38] sm:$0xff] (!%p585_p1)  ;;  %v461_v40 = vmax.f32 (!%p585_p1), %v445_v37, %v405_v23  ;;  %475 = vst [vmem:[#allocation7 + $0x20] sm:$0xff] (!%p585_p1), %v459_v35  ;;  %v453_v55 = vld [vmem:[#allocation7 + $0x70] sm:$0xff] (!%p585_p1)  ;;  %480 = vst [vmem:[#allocation7 + $0x48] sm:$0xff] (!%p585_p1), %v464_v47 }
 0x165   : > { %v462_v41 = vmax.f32 (!%p585_p1), %v446_v38, %v406_v21  ;;  %v469_v44 = vmax.f32 (!%p585_p1), %v453_v55, %v413_v24  ;;  %v454_v50 = vld [vmem:[#allocation7 + $0x78] sm:$0xff] (!%p585_p1)  ;;  %481 = vst [vmem:[#allocation7 + $0x50] sm:$0xff] (!%p585_p1), %v465_v49  ;;  %482 = vst [vmem:[#allocation7 + $0x58] sm:$0xff] (!%p585_p1), %v466_v51 }
 0x166   : > { %477 = vst [vmem:[#allocation7 + $0x30] sm:$0xff] %v461_v40  ;;  %v470_v56 = vmax.f32 %v454_v50, %v414_v22  ;;  %483 = vst [vmem:[#allocation7 + $0x60] sm:$0xff] %v467_v48 }
 0x167   : > { %478 = vst [vmem:[#allocation7 + $0x38] sm:$0xff] %v462_v41  ;;  %484 = vst [vmem:[#allocation7 + $0x68] sm:$0xff] %v468_v52 }
 0x168   : > { %485 = vst [vmem:[#allocation7 + $0x70] sm:$0xff] %v469_v44  ;;  %486 = vst [vmem:[#allocation7 + $0x78] sm:$0xff] %v470_v56 }
 0x169 PF: > { %p1208_p4 = scmp.eq.s32.totalorder %s573_s18, 3  ;;  %s952_s21 = smov [#allocation7]  }
 0x16a   : > { %s496_s7 = sshll.u32 %s952_s21, 4  ;;  %s497_s7 = int_to_ptr.vmem [resolvable:$true] %s496_s7 }
 0x16b   : > { %s862_s8 = scalar_lea.vmem %s497_s7, 2048  ;;  %p869_p10 = scmp.lt.s32.totalorder %s497_s7, %s497_s7 }
 0x16c   : > { %p863_p5 = scmp.ne.s32.totalorder %s497_s7, %s862_s8  ;;  %p870_p11 = scmp.lt.s32.totalorder %s862_s8, %s862_s8 }
 0x16e   : > { %p864_p8 = pnand %p863_p5, %p1208_p4  ;;  %p871_p13 = por %p870_p11, %p869_p10 }
 0x170   : > { %p865_p9 = pneg %p864_p8 }
 0x172   : > { %p872_p2 = pnand %p871_p13, %p865_p9 }
 0x174   : > { %875 = shalt.err (!%p872_p2)
}
 0x175   : > { %s876_s18 = scalar_lea.hbm %s1255_s3, 2048 }
 0x176   : > { %p877_p3 = scmp.ne.s32.totalorder %s1255_s3, %s876_s18  ;;  %p882_p6 = scmp.lt.u32.totalorder %s876_s18, %s1255_s3 }
 0x178   : > { %p878_p12 = pnand %p877_p3, %p1208_p4 }
 0x17a   : > { %p879_p0 = pneg %p878_p12 }
 0x17c   : > { %p884_p7 = pnand %p882_p6, %p879_p0 }
 0x17e   : > { %887 = shalt.err (!%p884_p7)
}
 0x17f   : > { %s953_s22 = smov 128   ;;  %s954_s28 = smov 8  }
 0x180   : > { %734 = dma.vmem_to_hbm [thread:$0]  (%p1208_p4), %s497_s7, 2048, %s1255_s3, [#allocation4], %s953_s22, %s953_s22, %s954_s28  }
 0x181   : > { %921 = dma.done.wait (%p1208_p4), [#allocation4], 2048  }
 0x182   : > { %923 = vsyncadd (%p1208_p4), [#allocation4], 4294965248 }
 0x183 PF: > { %s18_s17 = sadd.s32 1, %s946_s17   ;;  %s1269_s12 = smov %s930_s13 }
 0x184   : > { %p15_p1 = scmp.ge.s32.totalorder %s18_s17, 6   ;;  %s1270_s13 = smov %s934_s14 }
 0x185   : > { %s1271_s14 = smov %s1063_s27  ;;  %s1272_s15 = smov %s942_s16 }
 0x186   : > { %s1273_s16 = smov %s1275_s25  ;;  %17 = sbr.rel (!%p15_p1) target bundleno = 6 (0x6), region = 82 }
 0x18d   :  { %512 = vsyncpa [#allocation3], 1 }
 0x18e   :  { %514 = vsyncpa [#allocation3 + $0x1], 1 }
 0x18f   :  { %515 = vsyncpa [#allocation6], 1 }
 0x190   :  { %516 = vsyncpa [#allocation4], 1 }
 0x191   :  { %518 = vsyncpa [#allocation4 + $0x1], 1 }

</bundles_post_ra>
